<compile_context>
chip_gen: v6e
topology: v6e:2x2x1
jax: 0.10.0
libtpu: 0.0.40
codegen_flags: <defaults>
</compile_context>

<pallas_src>
import jax
import jax.numpy as jnp
from jax.experimental import pallas as pl
from jax.experimental.pallas import tpu as pltpu


def _deinterleave_kernel(xin_ref, out_ref):
    # xin_ref : (TB, 3*TN)  interleaved x0,y0,z0,x1,y1,z1,... per batch row
    # out_ref : (3*TB, TN)  rows ordered (b0,x),(b0,y),(b0,z),(b1,x),...
    tb = xin_ref.shape[0]
    tn = out_ref.shape[1]
    x = xin_ref[...]                        # dense (TB, 3*TN) load
    x = x.reshape(tb, tn, 3)                # split the interleaved lane axis
    x = jnp.transpose(x, (0, 2, 1))         # (TB, 3, TN) minor-dim transpose
    out_ref[...] = x.reshape(tb * 3, tn)    # dense (3*TB, TN) store


def _choose_tiles(B, N, itemsize):
    """Pick (TB, TN) satisfying the (8,128)/full-extent rule with lane-dense
    input blocks (TB, 3*TN) and sublane-dense output blocks (3*TB, TN)."""
    # Lane axis: largest multiple-of-128 divisor of N up to a cap, else full N.
    if N % 128 == 0:
        cap = 8192
        tn = 128
        cand = 128
        while cand <= min(N, cap):
            if N % cand == 0:
                tn = cand
            cand += 128
    else:
        tn = N

    # Sublane axis: multiple of 8 dividing B, grown until ~1 MiB of input per
    # grid step, else the full B.
    bytes_per_b = 3 * tn * itemsize
    budget = 1 << 20
    if B % 8 == 0:
        tb = 8
        cand = 16
        while cand <= B:
            if B % cand == 0 and cand * bytes_per_b <= budget:
                tb = cand
            cand += 8
    else:
        tb = B
    return tb, tn


def _maybe_split_for_megacore(B, N, tb, tn):
    """Ensure >= 2 parallel grid steps when legal, so both v7x cores work."""
    if (B // tb) * (N // tn) >= 2:
        return tb, tn
    if tn == N and N % 256 == 0:
        return tb, N // 2
    if tb == B and B % 16 == 0:
        return B // 2, tn
    return tb, tn


def group_all(new_xyz, xyz, features=None):
    """Pallas implementation of GroupAll.forward.

    new_xyz is ignored (kept for signature parity with the PyTorch module).
    Returns (grouped_xyz, grouped_features) with shapes
    (B, 3, 1, N) and (B, C, 1, N).
    """
    del new_xyz  # ignored, matching the reference module
    B, N, three = xyz.shape
    assert three == 3

    itemsize = jnp.dtype(xyz.dtype).itemsize
    TB, TN = _choose_tiles(B, N, itemsize)
    TB, TN = _maybe_split_for_megacore(B, N, TB, TN)
    grid = (B // TB, N // TN)

    # Free, contiguous views: (B, N, 3) -> (B, 3N) in, (B*3, N) out.
    xyz_flat = xyz.reshape(B, 3 * N)

    cp_kwargs = dict(dimension_semantics=("parallel", "parallel"))
    est_vmem = 4 * TB * 3 * TN * itemsize  # double-buffered in + out blocks
    if est_vmem > 12 * (1 << 20):
        # Only reachable for huge, non-128-aligned N; leave headroom.
        cp_kwargs["vmem_limit_bytes"] = min(3 * est_vmem, 48 * (1 << 20))

    out_flat = pl.pallas_call(
        _deinterleave_kernel,
        out_shape=jax.ShapeDtypeStruct((B * 3, N), xyz.dtype),
        grid=grid,
        in_specs=[pl.BlockSpec((TB, 3 * TN), lambda b, n: (b, n))],
        out_specs=pl.BlockSpec((3 * TB, TN), lambda b, n: (b, n)),
        compiler_params=pltpu.CompilerParams(**cp_kwargs),
    )(xyz_flat)

    grouped_xyz = out_flat.reshape(B, 3, 1, N)  # free reshape

    grouped_features = None
    if features is not None:
        Bf, C, Nf = features.shape
        assert Bf == B and Nf == N
        # unsqueeze is metadata-only: no kernel, no HBM traffic.
        grouped_features = features[:, :, None, :]  # (B, C, 1, N)

    return grouped_xyz, grouped_features


if __name__ == "__main__":
    key = jax.random.PRNGKey(0)
    k1, k2, k3 = jax.random.split(key, 3)

    B, N, C = 2, 16, 4
    xyz = jax.random.normal(k1, (B, N, 3), dtype=jnp.float32)
    features = jax.random.normal(k2, (B, C, N), dtype=jnp.float32)
    new_xyz = jax.random.normal(k3, (B, 1, 3), dtype=jnp.float32)  # ignored

    grouped_xyz, grouped_features = group_all(new_xyz, xyz, features)
    jax.block_until_ready(grouped_xyz)
    jax.block_until_ready(grouped_features)

    # Reference semantics (plain JAX) for verification.
    ref_xyz = jnp.transpose(xyz, (0, 2, 1))[:, :, None, :]   # (B, 3, 1, N)
    ref_feat = features[:, :, None, :]                       # (B, C, 1, N)

    assert grouped_xyz.shape == (B, 3, 1, N)
    assert grouped_features.shape == (B, C, 1, N)
    assert jnp.array_equal(grouped_xyz, ref_xyz)
    assert jnp.array_equal(grouped_features, ref_feat)

    # features=None path.
    gxyz_only, gfeat_only = group_all(new_xyz, xyz, None)
    jax.block_until_ready(gxyz_only)
    assert gfeat_only is None
    assert jnp.array_equal(gxyz_only, ref_xyz)

    # A second, tile-aligned shape exercising the dense (8,128) tiled path
    # (and the megacore split: grid becomes (1, 2)).
    B2, N2 = 8, 256
    xyz2 = jax.random.normal(k3, (B2, N2, 3), dtype=jnp.float32)
    gxyz2, _ = group_all(None, xyz2, None)
    jax.block_until_ready(gxyz2)
    ref2 = jnp.transpose(xyz2, (0, 2, 1))[:, :, None, :]
    assert gxyz2.shape == (B2, 3, 1, N2)
    assert jnp.array_equal(gxyz2, ref2)

    print("KERNEL_OK")
</pallas_src>

<mosaic_0001>
module attributes {stable_mosaic.version = 11 : i64} {
  func.func @_deinterleave_kernel(%arg0: i32, %arg1: i32, %arg2: memref<2x48xf32, #tpu.memory_space<vmem>>, %arg3: memref<6x16xf32, #tpu.memory_space<vmem>>) attributes {dimension_semantics = [#tpu.dimension_semantics<parallel>, #tpu.dimension_semantics<parallel>], iteration_bounds = array<i64: 1, 1>, scalar_prefetch = 0 : i64, scratch_operands = 0 : i64, tpu.core_type = #tpu.core_type<tc>, window_params = [{transform_indices = @transform_0, window_bounds = array<i64: 2, 48>}, {transform_indices = @transform_1, window_bounds = array<i64: 6, 16>}]} {
    %c0 = arith.constant 0 : index
    %c0_0 = arith.constant 0 : index
    %0 = vector.load %arg2[%c0, %c0_0] : memref<2x48xf32, #tpu.memory_space<vmem>>, vector<2x48xf32>
    %1 = vector.shape_cast %0 : vector<2x48xf32> to vector<2x16x3xf32>
    %2 = tpu.transpose %1, [0, 2, 1] : vector<2x16x3xf32> -> vector<2x3x16xf32>
    %3 = vector.shape_cast %2 : vector<2x3x16xf32> to vector<6x16xf32>
    %c0_1 = arith.constant 0 : index
    %c0_2 = arith.constant 0 : index
    %4 = vector.load %arg3[%c0_1, %c0_2] : memref<6x16xf32, #tpu.memory_space<vmem>>, vector<6x16xf32>
    tpu.vector_store %arg3[%c0_1, %c0_2], %3 {strides = array<i32>} : memref<6x16xf32, #tpu.memory_space<vmem>>, vector<6x16xf32>,
    return
  }
  func.func @transform_0(%arg0: i32, %arg1: i32) -> (i32, i32) {
    %c0_i32 = arith.constant 0 : i32
    return %arg0, %arg1 : i32, i32
  }
  func.func @transform_1(%arg0: i32, %arg1: i32) -> (i32, i32) {
    %c0_i32 = arith.constant 0 : i32
    return %arg0, %arg1 : i32, i32
  }
}

</mosaic_0001>

<bundles_post_ra>
// kernel: tpu_custom_call.1
= control target key start
LH: loop header
LB: loop body
LE: loop exit
PB: predicated region body
PF: predicated region fallthrough
CT: control target
= control target key end

     0   :  { %6 = vsyncpa [#allocation3], 0  ;;  %s439_s0 = inlined_call_operand.hbm [shape: f32[2,48], index: 0, kind: input, shape index: {}]   ;;  %s440_s1 = inlined_call_operand.hbm [shape: f32[6,16], index: 1, kind: output, shape index: {}]  }
   0x1   :  { %7 = vsyncpa [#allocation4], 0  ;;  %s403_s6 = smov [#allocation2]  }
   0x2   :  { %s14_s7 = sshll.u32 %s403_s6, 4  ;;  %s15_s7 = int_to_ptr.vmem [resolvable:$true] %s14_s7 }
   0x3   :  { %s367_s8 = scalar_lea.vmem %s15_s7, 32  ;;  %p372_p1 = scmp.lt.s32.totalorder %s15_s7, %s15_s7 }
   0x4   :  { %p368_p0 = scmp.ne.s32.totalorder %s15_s7, %s367_s8  ;;  %p373_p2 = scmp.lt.s32.totalorder %s367_s8, %s367_s8 }
   0x6   :  { %p374_p3 = por %p373_p2, %p372_p1 }
   0x8   :  { %p375_p4 = pnand %p374_p3, %p368_p0 }
   0xa   :  { %378 = shalt.err (!%p375_p4)
}
   0xb   :  { %17 = dma.hbm_to_vmem [thread:$0]  %s439_s0, 32, %s15_s7, [#allocation3]  }
   0xc   :  { %399 = dma.done.wait [#allocation3], 32  }
   0xd   :  { %400 = vsyncadd [#allocation3], 4294967264  ;;  %v21_v0 = vld [vmem:[#allocation2] sm:$0x3]  ;;  %s404_s11 = smov 119   ;;  %s405_s12 = smov 125   ;;  %v72_v5 = vlaneseq }
   0xe   :  { %29 = vrot.lane.b32.xlu1 %v21_v0, %s404_s11  ;;  %23 = vrot.lane.b32.xlu0 %v21_v0, %s405_s12  ;;  %s406_s13 = smov 116   ;;  %s407_s14 = smov 122   ;;  %v419_v3 = vmov 1983009808   ;;  %v420_v11 = vmov 1934713408  }
   0xf   :  { %s408_s15 = smov 110   ;;  %s409_s16 = smov 113   ;;  %v70_v4 = vunpack.c.l.s4 %v419_v3  ;;  %v73_v9 = vshrl.u32 %v72_v5, 7  ;;  %v102_v12 = vunpack.c.l.s4 %v420_v11  ;;  %v421_v54 = vmov 1966171168  }
  0x10   :  { %s410_s17 = smov 104   ;;  %s411_s18 = smov 107   ;;  %v235_v55 = vunpack.c.l.s4 %v421_v54  ;;  %vm321_vm0 = vcmask 128000  }
  0x11   :  { %s412_s0 = smov 98   ;;  %s413_s19 = smov 101   ;;  %v71_v8 = vunpack.c.0.s8 %v70_v4  ;;  %v103_v19 = vunpack.c.0.s8 %v102_v12 }
  0x12   :  { %32 = vrot.lane.b32.xlu1 %v21_v0, %s406_s13  ;;  %26 = vrot.lane.b32.xlu0 %v21_v0, %s407_s14  ;;  %s414_s20 = smov 92   ;;  %s415_s21 = smov 95   ;;  %v236_v56 = vunpack.c.0.s8 %v235_v55 }
  0x13   :  { %s416_s22 = smov 86   ;;  %s417_s23 = smov 89   ;;  %v74_v15 = vsub.s32 %v71_v8, %v73_v9  ;;  %v106_v27 = vsub.s32 %v103_v19, %v73_v9 }
  0x14   :  { %s418_s24 = smov 83   ;;  %v239_v57 = vsub.s32 %v236_v56, %v73_v9  ;;  %s422_s25 = smov [#allocation5]  }
  0x15   :  { %s329_s26 = sshll.u32 %s422_s25, 4  ;;  %s330_s26 = int_to_ptr.vmem [resolvable:$true] %s329_s26 }
  0x16   :  { %38 = vrot.lane.b32.xlu1 %v21_v0, %s408_s15  ;;  %35 = vrot.lane.b32.xlu0 %v21_v0, %s409_s16  ;;  %s379_s27 = scalar_lea.vmem %s330_s26, 128  ;;  %p384_p6 = scmp.lt.s32.totalorder %s330_s26, %s330_s26 }
  0x17   :  { %p380_p5 = scmp.ne.s32.totalorder %s330_s26, %s379_s27  ;;  %p385_p7 = scmp.lt.s32.totalorder %s379_s27, %s379_s27 }
  0x19   :  { %p386_p8 = por %p385_p7, %p384_p6 }
  0x1a   :  { %44 = vrot.lane.b32.xlu1 %v21_v0, %s410_s17  ;;  %41 = vrot.lane.b32.xlu0 %v21_v0, %s411_s18 }
  0x1b   :  { %p387_p9 = pnand %p386_p8, %p380_p5 }
  0x1e   :  { %50 = vrot.lane.b32.xlu1 %v21_v0, %s412_s0  ;;  %47 = vrot.lane.b32.xlu0 %v21_v0, %s413_s19 }
  0x22   :  { %56 = vrot.lane.b32.xlu1 %v21_v0, %s414_s20  ;;  %53 = vrot.lane.b32.xlu0 %v21_v0, %s415_s21 }
  0x26   :  { %62 = vrot.lane.b32.xlu1 %v21_v0, %s416_s22  ;;  %59 = vrot.lane.b32.xlu0 %v21_v0, %s417_s23 }
  0x2a   :  { %65 = vrot.lane.b32.xlu0 %v21_v0, %s418_s24 }
  0x80   :  { %v30_v1 = vpop.permute.xlu1 %29  ;;  %v24_v2 = vpop.permute.xlu0 %23 }
  0x81   :  { %v76_v16 = vcombine.low %v24_v2, %v30_v1 }
  0x83   :  { %v83_v22 = vrot.slane %v76_v16, %v74_v15 }
  0x84   :  { %v33_v6 = vpop.permute.xlu1 %32  ;;  %v27_v7 = vpop.permute.xlu0 %26 }
  0x85   :  { %v68_v10 = vcombine.low %v21_v0, %v27_v7 }
  0x87   :  { %v75_v17 = vrot.slane %v68_v10, %v74_v15 }
  0x88   :  { %v39_v13 = vpop.permute.xlu1 %38  ;;  %v36_v14 = vpop.permute.xlu0 %35 }
  0x89   :  { %v84_v18 = vcombine.low %v33_v6, %v39_v13  ;;  %v100_v24 = vcombine.low %v75_v17, %v83_v22 }
  0x8b   :  { %v91_v25 = vrot.slane %v84_v18, %v74_v15  ;;  %v107_v31 = vrot.slane %v100_v24, %v106_v27 }
  0x8c   :  { %v45_v20 = vpop.permute.xlu1 %44  ;;  %v42_v21 = vpop.permute.xlu0 %41 }
  0x8d   :  { %v92_v23 = vcombine.low %v36_v14, %v42_v21 }
  0x8f   :  { %v99_v26 = vrot.slane %v92_v23, %v74_v15 }
  0x90   :  { %v51_v28 = vpop.permute.xlu1 %50  ;;  %v48_v29 = vpop.permute.xlu0 %47 }
  0x91   :  { %v108_v30 = vcombine.low %v91_v25, %v99_v26  ;;  %v118_v40 = vcombine.low %v45_v20, %v51_v28 }
  0x93   :  { %v115_v32 = vrot.slane %v108_v30, %v106_v27  ;;  %v125_v44 = vrot.slane %v118_v40, %v74_v15 }
  0x94   :  { %v57_v33 = vpop.permute.xlu1 %56  ;;  %v54_v34 = vpop.permute.xlu0 %53 }
  0x95   :  { %v117_v35 = vcombine.high %v107_v31, %v115_v32  ;;  %v116_v36 = vcombine.low %v107_v31, %v115_v32  ;;  %v126_v37 = vcombine.low %v48_v29, %v54_v34 }
  0x97   :  { %200 = vxpose.xlu0.b32.start [1/2] (short) (narrow) %v117_v35, 8  ;;  %168 = vxpose.xlu1.b32.start [1/2] (short) (narrow) %v116_v36, 8  ;;  %v133_v41 = vrot.slane %v126_v37, %v74_v15 }
  0x98   :  { %v63_v38 = vpop.permute.xlu1 %62  ;;  %v60_v39 = vpop.permute.xlu0 %59 }
  0x99   :  { %v134_v42 = vcombine.low %v57_v33, %v63_v38  ;;  %v150_v46 = vcombine.low %v125_v44, %v133_v41 }
  0x9b   :  { %v141_v47 = vrot.slane %v134_v42, %v74_v15  ;;  %v157_v50 = vrot.slane %v150_v46, %v106_v27 }
  0x9c   :  { %v66_v43 = vpop.permute.xlu0 %65 }
  0x9d   :  { %v142_v45 = vcombine.low %v60_v39, %v66_v43 }
  0x9f   :  { %v149_v48 = vrot.slane %v142_v45, %v74_v15 }
  0xa1   :  { %v158_v49 = vcombine.low %v141_v47, %v149_v48 }
  0xa3   :  { %v165_v51 = vrot.slane %v158_v49, %v106_v27 }
  0xa5   :  { %v167_v52 = vcombine.high %v157_v50, %v165_v51  ;;  %v166_v53 = vcombine.low %v157_v50, %v165_v51 }
  0xa7   :  { %201 = vxpose.xlu0.b32.end [2/2] (short) (narrow) %v167_v52, 8  ;;  %169 = vxpose.xlu1.b32.end [2/2] (short) (narrow) %v166_v53, 8 }
 0x11f   :  { %v184_v58 = vpop.trf.xlu1  ;;  %v216_v59 = vpop.trf.xlu0 }
 0x120   :  { %v240_v60 = vrot.slane %v184_v58, %v239_v57  ;;  %v263_v61 = vrot.slane %v216_v59, %v239_v57 }
 0x122   :  { %v241_v62 = vcombine.high %v240_v60, %v240_v60  ;;  %v248_v63 = vrot.slane %v240_v60, %v239_v57  ;;  %v264_v0 = vcombine.high %v263_v61, %v263_v61  ;;  %v271_v1 = vrot.slane %v263_v61, %v239_v57 }
 0x124   :  { %v255_v2 = vrot.slane %v241_v62, %v239_v57  ;;  %v256_v3 = vcombine.high %v248_v63, %v248_v63  ;;  %v278_v4 = vrot.slane %v264_v0, %v239_v57  ;;  %v279_v5 = vcombine.high %v271_v1, %v271_v1 }
 0x126   :  { %v280_v6 = vcombine.low %v248_v63, %v255_v2  ;;  %v281_v7 = vcombine.low %v256_v3, %v271_v1  ;;  %v282_v8 = vcombine.low %v278_v4, %v279_v5 }
 0x128   :  { %v289_v10 = vrot.slane %v280_v6, %v239_v57  ;;  %v296_v11 = vrot.slane %v281_v7, %v239_v57  ;;  %v303_v12 = vrot.slane %v282_v8, %v239_v57 }
 0x12a   :  { %v304_v13 = vcombine.low %v289_v10, %v296_v11  ;;  %v318_v9 = vrot.slane %v303_v12, %v239_v57 }
 0x12c   :  { %v311_v14 = vrot.slane %v304_v13, %v239_v57 }
 0x12e   :  { %v319_v15 = vcombine.low %v311_v14, %v318_v9 }
 0x130   :  { %322 = vst.msk [vmem:[#allocation5] sm:$0x3f] %vm321_vm0, %v319_v15 }
 0x131   :  { %390 = shalt.err (!%p387_p9)
}
 0x132   :  { %332 = dma.vmem_to_hbm [thread:$0]  %s330_s26, 128, %s440_s1, [#allocation4]  }
 0x133   :  { %401 = dma.done.wait [#allocation4], 128  }
 0x134   :  { %402 = vsyncadd [#allocation4], 4294967168 }
 0x135   :  { %336 = vsyncpa [#allocation3], 1 }
 0x136   :  { %337 = vsyncpa [#allocation4], 1 }

</bundles_post_ra>
